<compile_context>
chip_gen: v7x
topology: tpu7x:2x2x1
jax: 0.10.0
libtpu: 0.0.40
codegen_flags: <defaults>
</compile_context>

<pallas_src>
import functools

import jax
import jax.numpy as jnp
from jax import lax
from jax.experimental import pallas as pl
from jax.experimental.pallas import tpu as pltpu


def _uniform_bits(shape, row_off_u32, seed_u32, salt):
    """Counter-based per-element uint32 hash (portable PRNG for dropout).

    Value of element (global_row, col) depends only on (seed, salt, row, col),
    so the dropout mask is independent of the batch tiling and works both on
    real TPUs and in interpret mode (unlike pltpu.prng_*).
    """
    r = lax.broadcasted_iota(jnp.int32, shape, 0).astype(jnp.uint32) + row_off_u32
    c = lax.broadcasted_iota(jnp.int32, shape, 1).astype(jnp.uint32)
    v = (r * jnp.uint32(0x9E3779B1)) + (c * jnp.uint32(0x85EBCA77))
    v = v + seed_u32 + jnp.uint32(salt)
    v = v ^ (v >> 16)
    v = v * jnp.uint32(0x7FEB352D)
    v = v ^ (v >> 15)
    v = v * jnp.uint32(0x846CA68B)
    v = v ^ (v >> 16)
    return v


def mlp_kernel(seed_ref, x_ref, w1_ref, b1_ref, w2_ref, b2_ref, w3_ref, b3_ref,
               o_ref, *, thresh1, scale1, thresh2, scale2, block_rows):
    # Global row offset of this batch tile: mixes program_id into the PRNG so
    # each tile draws a distinct (and grid-invariant) dropout mask.
    row_off = (pl.program_id(0) * block_rows).astype(jnp.uint32)
    seed_u32 = seed_ref[0].astype(jnp.uint32)

    def dropout(h, thresh, scale, salt):
        # Inverted dropout (PyTorch training semantics). thresh == 0 => identity
        # (resolved at trace time).
        if thresh == 0:
            return h
        bits = _uniform_bits(h.shape, row_off, seed_u32, salt)
        return jnp.where(bits >= jnp.uint32(thresh),
                         h * jnp.float32(scale), jnp.float32(0.0))

    # linear1 + relu + dropout1  (bf16 MXU inputs, f32 accumulate / elementwise)
    h = jnp.dot(x_ref[...].astype(jnp.bfloat16), w1_ref[...],
                preferred_element_type=jnp.float32) + b1_ref[...]
    h = jnp.maximum(h, 0.0)
    h = dropout(h, thresh1, scale1, salt=0x1234567)

    # linear2 + relu + dropout2
    h = jnp.dot(h.astype(jnp.bfloat16), w2_ref[...],
                preferred_element_type=jnp.float32) + b2_ref[...]
    h = jnp.maximum(h, 0.0)
    h = dropout(h, thresh2, scale2, salt=0x89ABCDE)

    # linear3 + relu   (output columns are zero-padded to a lane-dense 128)
    h = jnp.dot(h.astype(jnp.bfloat16), w3_ref[...],
                preferred_element_type=jnp.float32) + b3_ref[...]
    o_ref[...] = jnp.maximum(h, 0.0)


def mm1_forward(params, x, *, drop_prob1, drop_prob2, seed=0, train=True,
                block_rows=128):
    """Fused MM1 forward pass. x: (B, C, H, W) float32 (NCHW, like PyTorch)."""
    assert 0.0 <= drop_prob1 < 1.0 and 0.0 <= drop_prob2 < 1.0
    w1, b1, w2, b2, w3, b3 = params
    B = x.shape[0]
    x2d = x.reshape(B, -1).astype(jnp.float32)          # nn.Flatten (row-major)
    d_in = x2d.shape[1]
    h1, h2, d_out = w1.shape[1], w2.shape[1], w3.shape[1]

    # Batch tiling: round B up to an MXU-friendly 128-row tile, zero-pad rows.
    # (For very wide flattened inputs on v7x's 64 MiB VMEM, shrink block_rows.)
    grid_b = pl.cdiv(B, block_rows)
    b_pad = grid_b * block_rows
    if b_pad != B:
        x2d = jnp.pad(x2d, ((0, b_pad - B), (0, 0)))

    # Lane-dense output: pad the final layer to a multiple of 128 columns.
    d_out_pad = 128 * pl.cdiv(d_out, 128)
    w3p = jnp.pad(w3, ((0, 0), (0, d_out_pad - d_out)))
    b3p = jnp.pad(b3, ((0, 0), (0, d_out_pad - d_out)))

    # bf16 MXU inputs (accumulation stays f32 inside the kernel).
    w1b = w1.astype(jnp.bfloat16)
    w2b = w2.astype(jnp.bfloat16)
    w3b = w3p.astype(jnp.bfloat16)

    def to_thresh(p):
        return min(max(int(round(p * (2 ** 32))), 0), 2 ** 32 - 1)

    p1 = drop_prob1 if train else 0.0
    p2 = drop_prob2 if train else 0.0
    kernel = functools.partial(
        mlp_kernel,
        thresh1=to_thresh(p1), scale1=(1.0 / (1.0 - p1)) if p1 > 0.0 else 1.0,
        thresh2=to_thresh(p2), scale2=(1.0 / (1.0 - p2)) if p2 > 0.0 else 1.0,
        block_rows=block_rows)

    seed_arr = jnp.array([seed], dtype=jnp.int32)

    flops = 2 * b_pad * (d_in * h1 + h1 * h2 + h2 * d_out_pad)
    bytes_accessed = (4 * b_pad * d_in + 4 * b_pad * d_out_pad
                      + 2 * (d_in * h1 + h1 * h2 + h2 * d_out_pad)
                      + 4 * (h1 + h2 + d_out_pad))

    out = pl.pallas_call(
        kernel,
        out_shape=jax.ShapeDtypeStruct((b_pad, d_out_pad), jnp.float32),
        grid_spec=pltpu.PrefetchScalarGridSpec(
            num_scalar_prefetch=1,          # seed lands in SMEM
            grid=(grid_b,),
            in_specs=[
                # x: blocked over batch -> auto double-buffered input pipeline.
                pl.BlockSpec((block_rows, d_in), lambda i, seed: (i, 0)),
                # weights / biases: full-array blocks, VMEM-resident across grid.
                pl.BlockSpec((d_in, h1), lambda i, seed: (0, 0)),
                pl.BlockSpec((1, h1), lambda i, seed: (0, 0)),
                pl.BlockSpec((h1, h2), lambda i, seed: (0, 0)),
                pl.BlockSpec((1, h2), lambda i, seed: (0, 0)),
                pl.BlockSpec((h2, d_out_pad), lambda i, seed: (0, 0)),
                pl.BlockSpec((1, d_out_pad), lambda i, seed: (0, 0)),
            ],
            out_specs=pl.BlockSpec((block_rows, d_out_pad),
                                   lambda i, seed: (i, 0)),
        ),
        compiler_params=pltpu.CompilerParams(
            dimension_semantics=("parallel",),   # batch tiles shard across TCs
        ),
        cost_estimate=pl.CostEstimate(flops=flops, transcendentals=0,
                                      bytes_accessed=bytes_accessed),
    )(seed_arr, x2d, w1b, b1, w2b, b2, w3b, b3p)

    return out[:B, :d_out]


def init_params(key, num_inputs, num_hiddens1, num_hiddens2, num_outputs):
    """Matches PyTorch nn.Linear default init: U(-k, k), k = 1/sqrt(fan_in).
    Weights stored as (in, out) so the kernel does x @ W (== x @ W_torch.T)."""
    def linear(k, fan_in, fan_out):
        kw, kb = jax.random.split(k)
        bound = 1.0 / (fan_in ** 0.5)
        w = jax.random.uniform(kw, (fan_in, fan_out), jnp.float32, -bound, bound)
        b = jax.random.uniform(kb, (1, fan_out), jnp.float32, -bound, bound)
        return w, b

    k1, k2, k3 = jax.random.split(key, 3)
    w1, b1 = linear(k1, num_inputs, num_hiddens1)
    w2, b2 = linear(k2, num_hiddens1, num_hiddens2)
    w3, b3 = linear(k3, num_hiddens2, num_outputs)
    return (w1, b1, w2, b2, w3, b3)


if __name__ == "__main__":
    # Small shapes consistent with the module: x (B, C, H, W) flattened to
    # num_inputs = C*H*W features.
    B, C, H, W = 8, 1, 8, 8
    num_inputs = C * H * W          # 64
    num_hiddens1 = 128
    num_hiddens2 = 64
    num_outputs = 16
    drop_prob1, drop_prob2 = 0.2, 0.5

    key = jax.random.PRNGKey(0)
    k_x, k_p = jax.random.split(key)
    x = jax.random.normal(k_x, (B, C, H, W), dtype=jnp.float32)
    params = init_params(k_p, num_inputs, num_hiddens1, num_hiddens2, num_outputs)

    y = mm1_forward(params, x, drop_prob1=drop_prob1, drop_prob2=drop_prob2,
                    seed=0, train=True)
    y = jax.block_until_ready(y)

    assert y.shape == (B, num_outputs)
    assert bool(jnp.all(y >= 0.0))  # final ReLU
    print("KERNEL_OK")
</pallas_src>

<mosaic_0001>
module attributes {stable_mosaic.version = 11 : i64} {
  func.func @mlp_kernel(%arg0: i32, %arg1: memref<1xi32, #tpu.memory_space<smem>>, %arg2: memref<128x64xf32, #tpu.memory_space<vmem>>, %arg3: memref<64x128xbf16, #tpu.memory_space<vmem>>, %arg4: memref<1x128xf32, #tpu.memory_space<vmem>>, %arg5: memref<128x64xbf16, #tpu.memory_space<vmem>>, %arg6: memref<1x64xf32, #tpu.memory_space<vmem>>, %arg7: memref<64x128xbf16, #tpu.memory_space<vmem>>, %arg8: memref<1x128xf32, #tpu.memory_space<vmem>>, %arg9: memref<128x128xf32, #tpu.memory_space<vmem>>) attributes {dimension_semantics = [#tpu.dimension_semantics<parallel>], iteration_bounds = array<i64: 1>, scalar_prefetch = 1 : i64, scratch_operands = 0 : i64, tpu.core_type = #tpu.core_type<tc>, window_params = [{transform_indices = @transform_0, window_bounds = array<i64: 128, 64>}, {pipeline_mode = #tpu.pipeline_mode<synchronous>, transform_indices = @transform_1, window_bounds = array<i64: 64, 128>}, {pipeline_mode = #tpu.pipeline_mode<synchronous>, transform_indices = @transform_2, window_bounds = array<i64: 1, 128>}, {pipeline_mode = #tpu.pipeline_mode<synchronous>, transform_indices = @transform_3, window_bounds = array<i64: 128, 64>}, {pipeline_mode = #tpu.pipeline_mode<synchronous>, transform_indices = @transform_4, window_bounds = array<i64: 1, 64>}, {pipeline_mode = #tpu.pipeline_mode<synchronous>, transform_indices = @transform_5, window_bounds = array<i64: 64, 128>}, {pipeline_mode = #tpu.pipeline_mode<synchronous>, transform_indices = @transform_6, window_bounds = array<i64: 1, 128>}, {transform_indices = @transform_7, window_bounds = array<i64: 128, 128>}]} {
    %c128_i32 = arith.constant 128 : i32
    %0 = arith.muli %arg0, %c128_i32 : i32
    %c0 = arith.constant 0 : index
    %1 = memref.load %arg1[%c0] : memref<1xi32, #tpu.memory_space<smem>>
    %c0_0 = arith.constant 0 : index
    %c0_1 = arith.constant 0 : index
    %2 = vector.load %arg2[%c0_0, %c0_1] : memref<128x64xf32, #tpu.memory_space<vmem>>, vector<128x64xf32>
    %3 = arith.truncf %2 : vector<128x64xf32> to vector<128x64xbf16>
    %c0_2 = arith.constant 0 : index
    %c0_3 = arith.constant 0 : index
    %4 = vector.load %arg3[%c0_2, %c0_3] : memref<64x128xbf16, #tpu.memory_space<vmem>>, vector<64x128xbf16>
    %cst = arith.constant dense<0.000000e+00> : vector<128x128xf32>
    %5 = tpu.matmul %3, %4, %cst {dimension_numbers = #tpu.dot_dimension_numbers<[1], [0], [0], [1], [0, 0, 1, 1], [], []>} : vector<128x64xbf16>, vector<64x128xbf16>, vector<128x128xf32> -> vector<128x128xf32>
    %c0_4 = arith.constant 0 : index
    %c0_5 = arith.constant 0 : index
    %6 = vector.load %arg4[%c0_4, %c0_5] : memref<1x128xf32, #tpu.memory_space<vmem>>, vector<1x128xf32>
    %7 = vector.broadcast %6 : vector<1x128xf32> to vector<128x128xf32>
    %8 = arith.addf %5, %7 : vector<128x128xf32>
    %cst_6 = arith.constant 0.000000e+00 : f32
    %9 = vector.broadcast %cst_6 : f32 to vector<128x128xf32>
    %10 = arith.maximumf %8, %9 : vector<128x128xf32>
    %11 = tpu.iota {dimensions = array<i32: 0>} : vector<128x128xi32>
    %12 = vector.broadcast %0 : i32 to vector<128x128xi32>
    %13 = arith.addi %11, %12 : vector<128x128xi32>
    %14 = tpu.iota {dimensions = array<i32: 1>} : vector<128x128xi32>
    %c-1640531535_i32 = arith.constant -1640531535 : i32
    %15 = vector.broadcast %c-1640531535_i32 : i32 to vector<128x128xi32>
    %16 = arith.muli %13, %15 : vector<128x128xi32>
    %c-2048144777_i32 = arith.constant -2048144777 : i32
    %17 = vector.broadcast %c-2048144777_i32 : i32 to vector<128x128xi32>
    %18 = arith.muli %14, %17 : vector<128x128xi32>
    %19 = arith.addi %16, %18 : vector<128x128xi32>
    %20 = vector.broadcast %1 : i32 to vector<128x128xi32>
    %21 = arith.addi %19, %20 : vector<128x128xi32>
    %c19088743_i32 = arith.constant 19088743 : i32
    %22 = vector.broadcast %c19088743_i32 : i32 to vector<128x128xi32>
    %23 = arith.addi %21, %22 : vector<128x128xi32>
    %c16_i32 = arith.constant 16 : i32
    %24 = vector.broadcast %c16_i32 : i32 to vector<128x128xi32>
    %25 = arith.shrui %23, %24 : vector<128x128xi32>
    %26 = arith.xori %23, %25 : vector<128x128xi32>
    %c2146121005_i32 = arith.constant 2146121005 : i32
    %27 = vector.broadcast %c2146121005_i32 : i32 to vector<128x128xi32>
    %28 = arith.muli %26, %27 : vector<128x128xi32>
    %c15_i32 = arith.constant 15 : i32
    %29 = vector.broadcast %c15_i32 : i32 to vector<128x128xi32>
    %30 = arith.shrui %28, %29 : vector<128x128xi32>
    %31 = arith.xori %28, %30 : vector<128x128xi32>
    %c-2073254261_i32 = arith.constant -2073254261 : i32
    %32 = vector.broadcast %c-2073254261_i32 : i32 to vector<128x128xi32>
    %33 = arith.muli %31, %32 : vector<128x128xi32>
    %c16_i32_7 = arith.constant 16 : i32
    %34 = vector.broadcast %c16_i32_7 : i32 to vector<128x128xi32>
    %35 = arith.shrui %33, %34 : vector<128x128xi32>
    %36 = arith.xori %33, %35 : vector<128x128xi32>
    %c858993459_i32 = arith.constant 858993459 : i32
    %37 = vector.broadcast %c858993459_i32 : i32 to vector<128x128xi32>
    %38 = arith.cmpi uge, %36, %37 : vector<128x128xi32>
    %cst_8 = arith.constant 1.250000e+00 : f32
    %39 = vector.broadcast %cst_8 : f32 to vector<128x128xf32>
    %40 = arith.mulf %10, %39 : vector<128x128xf32>
    %cst_9 = arith.constant 0.000000e+00 : f32
    %41 = vector.broadcast %cst_9 : f32 to vector<128x128xf32>
    %42 = arith.select %38, %40, %41 : vector<128x128xi1>, vector<128x128xf32>
    %43 = arith.truncf %42 : vector<128x128xf32> to vector<128x128xbf16>
    %c0_10 = arith.constant 0 : index
    %c0_11 = arith.constant 0 : index
    %44 = vector.load %arg5[%c0_10, %c0_11] : memref<128x64xbf16, #tpu.memory_space<vmem>>, vector<128x64xbf16>
    %cst_12 = arith.constant dense<0.000000e+00> : vector<128x64xf32>
    %45 = tpu.matmul %43, %44, %cst_12 {dimension_numbers = #tpu.dot_dimension_numbers<[1], [0], [0], [1], [0, 0, 1, 1], [], []>} : vector<128x128xbf16>, vector<128x64xbf16>, vector<128x64xf32> -> vector<128x64xf32>
    %c0_13 = arith.constant 0 : index
    %c0_14 = arith.constant 0 : index
    %46 = vector.load %arg6[%c0_13, %c0_14] : memref<1x64xf32, #tpu.memory_space<vmem>>, vector<1x64xf32>
    %47 = vector.broadcast %46 : vector<1x64xf32> to vector<128x64xf32>
    %48 = arith.addf %45, %47 : vector<128x64xf32>
    %cst_15 = arith.constant 0.000000e+00 : f32
    %49 = vector.broadcast %cst_15 : f32 to vector<128x64xf32>
    %50 = arith.maximumf %48, %49 : vector<128x64xf32>
    %51 = tpu.iota {dimensions = array<i32: 0>} : vector<128x64xi32>
    %52 = vector.broadcast %0 : i32 to vector<128x64xi32>
    %53 = arith.addi %51, %52 : vector<128x64xi32>
    %54 = tpu.iota {dimensions = array<i32: 1>} : vector<128x64xi32>
    %c-1640531535_i32_16 = arith.constant -1640531535 : i32
    %55 = vector.broadcast %c-1640531535_i32_16 : i32 to vector<128x64xi32>
    %56 = arith.muli %53, %55 : vector<128x64xi32>
    %c-2048144777_i32_17 = arith.constant -2048144777 : i32
    %57 = vector.broadcast %c-2048144777_i32_17 : i32 to vector<128x64xi32>
    %58 = arith.muli %54, %57 : vector<128x64xi32>
    %59 = arith.addi %56, %58 : vector<128x64xi32>
    %60 = vector.broadcast %1 : i32 to vector<128x64xi32>
    %61 = arith.addi %59, %60 : vector<128x64xi32>
    %c144358622_i32 = arith.constant 144358622 : i32
    %62 = vector.broadcast %c144358622_i32 : i32 to vector<128x64xi32>
    %63 = arith.addi %61, %62 : vector<128x64xi32>
    %c16_i32_18 = arith.constant 16 : i32
    %64 = vector.broadcast %c16_i32_18 : i32 to vector<128x64xi32>
    %65 = arith.shrui %63, %64 : vector<128x64xi32>
    %66 = arith.xori %63, %65 : vector<128x64xi32>
    %c2146121005_i32_19 = arith.constant 2146121005 : i32
    %67 = vector.broadcast %c2146121005_i32_19 : i32 to vector<128x64xi32>
    %68 = arith.muli %66, %67 : vector<128x64xi32>
    %c15_i32_20 = arith.constant 15 : i32
    %69 = vector.broadcast %c15_i32_20 : i32 to vector<128x64xi32>
    %70 = arith.shrui %68, %69 : vector<128x64xi32>
    %71 = arith.xori %68, %70 : vector<128x64xi32>
    %c-2073254261_i32_21 = arith.constant -2073254261 : i32
    %72 = vector.broadcast %c-2073254261_i32_21 : i32 to vector<128x64xi32>
    %73 = arith.muli %71, %72 : vector<128x64xi32>
    %c16_i32_22 = arith.constant 16 : i32
    %74 = vector.broadcast %c16_i32_22 : i32 to vector<128x64xi32>
    %75 = arith.shrui %73, %74 : vector<128x64xi32>
    %76 = arith.xori %73, %75 : vector<128x64xi32>
    %c-2147483648_i32 = arith.constant -2147483648 : i32
    %77 = vector.broadcast %c-2147483648_i32 : i32 to vector<128x64xi32>
    %78 = arith.cmpi uge, %76, %77 : vector<128x64xi32>
    %cst_23 = arith.constant 2.000000e+00 : f32
    %79 = vector.broadcast %cst_23 : f32 to vector<128x64xf32>
    %80 = arith.mulf %50, %79 : vector<128x64xf32>
    %cst_24 = arith.constant 0.000000e+00 : f32
    %81 = vector.broadcast %cst_24 : f32 to vector<128x64xf32>
    %82 = arith.select %78, %80, %81 : vector<128x64xi1>, vector<128x64xf32>
    %83 = arith.truncf %82 : vector<128x64xf32> to vector<128x64xbf16>
    %c0_25 = arith.constant 0 : index
    %c0_26 = arith.constant 0 : index
    %84 = vector.load %arg7[%c0_25, %c0_26] : memref<64x128xbf16, #tpu.memory_space<vmem>>, vector<64x128xbf16>
    %cst_27 = arith.constant dense<0.000000e+00> : vector<128x128xf32>
    %85 = tpu.matmul %83, %84, %cst_27 {dimension_numbers = #tpu.dot_dimension_numbers<[1], [0], [0], [1], [0, 0, 1, 1], [], []>} : vector<128x64xbf16>, vector<64x128xbf16>, vector<128x128xf32> -> vector<128x128xf32>
    %c0_28 = arith.constant 0 : index
    %c0_29 = arith.constant 0 : index
    %86 = vector.load %arg8[%c0_28, %c0_29] : memref<1x128xf32, #tpu.memory_space<vmem>>, vector<1x128xf32>
    %87 = vector.broadcast %86 : vector<1x128xf32> to vector<128x128xf32>
    %88 = arith.addf %85, %87 : vector<128x128xf32>
    %cst_30 = arith.constant 0.000000e+00 : f32
    %89 = vector.broadcast %cst_30 : f32 to vector<128x128xf32>
    %90 = arith.maximumf %88, %89 : vector<128x128xf32>
    %c0_31 = arith.constant 0 : index
    %c0_32 = arith.constant 0 : index
    %91 = vector.load %arg9[%c0_31, %c0_32] : memref<128x128xf32, #tpu.memory_space<vmem>>, vector<128x128xf32>
    tpu.vector_store %arg9[%c0_31, %c0_32], %90 {strides = array<i32>} : memref<128x128xf32, #tpu.memory_space<vmem>>, vector<128x128xf32>,
    return
  }
  func.func @transform_0(%arg0: i32, %arg1: memref<1xi32, #tpu.memory_space<smem>>) -> (i32, i32) {
    %c0_i32 = arith.constant 0 : i32
    %c0_i32_0 = arith.constant 0 : i32
    return %arg0, %c0_i32 : i32, i32
  }
  func.func @transform_1(%arg0: i32, %arg1: memref<1xi32, #tpu.memory_space<smem>>) -> (i32, i32) {
    %c0_i32 = arith.constant 0 : i32
    %c0_i32_0 = arith.constant 0 : i32
    %c0_i32_1 = arith.constant 0 : i32
    return %c0_i32, %c0_i32_0 : i32, i32
  }
  func.func @transform_2(%arg0: i32, %arg1: memref<1xi32, #tpu.memory_space<smem>>) -> (i32, i32) {
    %c0_i32 = arith.constant 0 : i32
    %c0_i32_0 = arith.constant 0 : i32
    %c0_i32_1 = arith.constant 0 : i32
    return %c0_i32, %c0_i32_0 : i32, i32
  }
  func.func @transform_3(%arg0: i32, %arg1: memref<1xi32, #tpu.memory_space<smem>>) -> (i32, i32) {
    %c0_i32 = arith.constant 0 : i32
    %c0_i32_0 = arith.constant 0 : i32
    %c0_i32_1 = arith.constant 0 : i32
    return %c0_i32, %c0_i32_0 : i32, i32
  }
  func.func @transform_4(%arg0: i32, %arg1: memref<1xi32, #tpu.memory_space<smem>>) -> (i32, i32) {
    %c0_i32 = arith.constant 0 : i32
    %c0_i32_0 = arith.constant 0 : i32
    %c0_i32_1 = arith.constant 0 : i32
    return %c0_i32, %c0_i32_0 : i32, i32
  }
  func.func @transform_5(%arg0: i32, %arg1: memref<1xi32, #tpu.memory_space<smem>>) -> (i32, i32) {
    %c0_i32 = arith.constant 0 : i32
    %c0_i32_0 = arith.constant 0 : i32
    %c0_i32_1 = arith.constant 0 : i32
    return %c0_i32, %c0_i32_0 : i32, i32
  }
  func.func @transform_6(%arg0: i32, %arg1: memref<1xi32, #tpu.memory_space<smem>>) -> (i32, i32) {
    %c0_i32 = arith.constant 0 : i32
    %c0_i32_0 = arith.constant 0 : i32
    %c0_i32_1 = arith.constant 0 : i32
    return %c0_i32, %c0_i32_0 : i32, i32
  }
  func.func @transform_7(%arg0: i32, %arg1: memref<1xi32, #tpu.memory_space<smem>>) -> (i32, i32) {
    %c0_i32 = arith.constant 0 : i32
    %c0_i32_0 = arith.constant 0 : i32
    return %arg0, %c0_i32 : i32, i32
  }
}

</mosaic_0001>

<bundles_post_ra>
// kernel: tpu_custom_call.1
= control target key start
LH: loop header
LB: loop body
LE: loop exit
PB: predicated region body
PF: predicated region fallthrough
CT: control target
= control target key end

     0   :  { %vm95_vm0 = vcmask 523264   ;;  %s1806_s0 = inlined_call_operand.<no memory space> [shape: s32[1], index: 0, kind: input, shape index: {}]   ;;  %s1807_s1 = inlined_call_operand.vmem [shape: f32[128,64], index: 1, kind: input, shape index: {}]   ;;  %s1808_s2 = inlined_call_operand.vmem [shape: bf16[64,128], index: 2, kind: input, shape index: {}]   ;;  %s1809_s3 = inlined_call_operand.vmem [shape: f32[1,128], index: 3, kind: input, shape index: {}]   ;;  %s1810_s4 = inlined_call_operand.vmem [shape: bf16[128,64], index: 4, kind: input, shape index: {}]   ;;  %s1811_s5 = inlined_call_operand.vmem [shape: f32[1,64], index: 5, kind: input, shape index: {}]   ;;  %s1812_s6 = inlined_call_operand.vmem [shape: bf16[64,128], index: 6, kind: input, shape index: {}]   ;;  %s1813_s7 = inlined_call_operand.vmem [shape: f32[1,128], index: 7, kind: input, shape index: {}]   ;;  %s1814_s8 = inlined_call_operand.hbm [shape: f32[128,128], index: 8, kind: output, shape index: {}]  }
   0x1   :  { %v1301_v0 = vld [vmem:[%s1808_s2] sm:$0xff]   ;;  %v1302_v1 = vld [vmem:[%s1808_s2 + $0x8] sm:$0xff]   ;;  %v1303_v2 = vld [vmem:[%s1808_s2 + $0x10] sm:$0xff]  }
   0x2   :  { %1210 = vmatprep.subr.bf16.mxu0 %v1301_v0  ;;  %v32_v3 = vld [vmem:[%s1807_s1] sm:$0xff]  ;;  %v33_v4 = vld [vmem:[%s1807_s1 + $0x8] sm:$0xff]  ;;  %v1304_v6 = vld [vmem:[%s1808_s2 + $0x18] sm:$0xff]  }
   0x3   :  { %1211 = vmatpush3.bf16.msra.mxu0 %v1301_v0  ;;  %v48_v5 = vpack.c.bf16 %v33_v4, %v32_v3  ;;  %v34_v7 = vld [vmem:[%s1807_s1 + $0x10] sm:$0xff]  ;;  %v35_v8 = vld [vmem:[%s1807_s1 + $0x18] sm:$0xff]  ;;  %v36_v9 = vld [vmem:[%s1807_s1 + $0x20] sm:$0xff] }
   0x4   :  { %1212 = vmatprep.subr.bf16.mxu0 %v1302_v1  ;;  %v1305_v10 = vld [vmem:[%s1810_s4] sm:$0xff]   ;;  %v1306_v11 = vld [vmem:[%s1810_s4 + $0x8] sm:$0xff]   ;;  %v49_v13 = vpack.c.bf16 %v35_v8, %v34_v7  ;;  %v1307_v14 = vld [vmem:[%s1810_s4 + $0x10] sm:$0xff]  }
   0x5   :  { %1218 = vmatprep.mubr.msk.bf16.mxu0 %vm95_vm0, %v48_v5  ;;  %v37_v12 = vld [vmem:[%s1807_s1 + $0x28] sm:$0xff]  ;;  %1234 = vmatprep.subr.bf16.mxu1 %v1305_v10  ;;  %v1308_v16 = vld [vmem:[%s1810_s4 + $0x18] sm:$0xff]   ;;  %v38_v17 = vld [vmem:[%s1807_s1 + $0x30] sm:$0xff] }
   0x6   :  { %1235 = vmatpush3.bf16.msra.mxu1 %v1305_v10  ;;  %v50_v15 = vpack.c.bf16 %v37_v12, %v36_v9  ;;  %v39_v18 = vld [vmem:[%s1807_s1 + $0x38] sm:$0xff] }
   0x7   :  { %1213 = vmatpush3.bf16.msra.mxu0 %v1302_v1  ;;  %1236 = vmatprep.subr.bf16.mxu1 %v1306_v11 }
   0x8   :  { %1214 = vmatprep.subr.bf16.mxu0 %v1303_v2 }
   0xa   :  { %1237 = vmatpush3.bf16.msra.mxu1 %v1306_v11 }
   0xb   :  { %1215 = vmatpush3.bf16.msra.mxu0 %v1303_v2  ;;  %1238 = vmatprep.subr.bf16.mxu1 %v1307_v14 }
   0xc   :  { %1216 = vmatprep.subr.bf16.mxu0 %v1304_v6 }
   0xf   :  { %1217 = vmatpush3.bf16.msra.mxu0 %v1304_v6 }
  0x12   :  { %1219 = vmatmul.mubr.msk.bf16.vlgmr.msra.gmra.mrb[0].mxu0 %vm95_vm0, %v49_v13 }
  0x13   :  { %1222 = vmatprep.mubr.msk.bf16.mxu0 %vm95_vm0, %v50_v15 }
  0x14   :  { %14 = vsyncpa [#allocation5], 0  ;;  %v40_v19 = vld [vmem:[%s1807_s1 + $0x40] sm:$0xff]  ;;  %v41_v20 = vld [vmem:[%s1807_s1 + $0x48] sm:$0xff]  ;;  %1239 = vmatpush3.bf16.msra.mxu1 %v1307_v14  ;;  %v51_v21 = vpack.c.bf16 %v39_v18, %v38_v17  ;;  %v233_v38 = vlaneseq  ;;  %v1508_v48 = vstv %s1806_s0 }
  0x15   :  { %1240 = vmatprep.subr.bf16.mxu1 %v1308_v16  ;;  %v1309_v22 = vld [vmem:[%s1810_s4 + $0x20] sm:$0xff]   ;;  %v52_v23 = vpack.c.bf16 %v41_v20, %v40_v19  ;;  %v42_v24 = vld [vmem:[%s1807_s1 + $0x50] sm:$0xff]  ;;  %v43_v25 = vld [vmem:[%s1807_s1 + $0x58] sm:$0xff] }
  0x16   :  { %v44_v26 = vld [vmem:[%s1807_s1 + $0x60] sm:$0xff]  ;;  %v45_v27 = vld [vmem:[%s1807_s1 + $0x68] sm:$0xff]  ;;  %v53_v28 = vpack.c.bf16 %v43_v25, %v42_v24  ;;  %v46_v30 = vld [vmem:[%s1807_s1 + $0x70] sm:$0xff]  ;;  %v268_v39 = vand.u32 127, %v233_v38  ;;  %v1496_v40 = vshrl.u32 %v233_v38, 7 }
  0x17   :  { %v54_v29 = vpack.c.bf16 %v45_v27, %v44_v26  ;;  %v47_v31 = vld [vmem:[%s1807_s1 + $0x78] sm:$0xff]  ;;  %v1310_v33 = vld [vmem:[%s1810_s4 + $0x28] sm:$0xff]   ;;  %v1311_v34 = vld [vmem:[%s1810_s4 + $0x30] sm:$0xff]  }
  0x18   :  { %1241 = vmatpush3.bf16.msra.mxu1 %v1308_v16  ;;  %v55_v32 = vpack.c.bf16 %v47_v31, %v46_v30  ;;  %v1312_v35 = vld [vmem:[%s1810_s4 + $0x38] sm:$0xff]   ;;  %v1484_v36 = vld [vmem:[%s1812_s6] sm:$0xff]   ;;  %v1489_v37 = vld [vmem:[%s1812_s6 + $0x8] sm:$0xff]   ;;  %v269_v41 = vmul.u32 2654435761, %v1496_v40  ;;  %v235_v43 = vadd.s32 8, %v1496_v40 }
  0x19   :  { %1242 = vmatprep.subr.bf16.mxu1 %v1309_v22  ;;  %1266 = vmatprep.subr.bf16.mxu0 %v1484_v36  ;;  %v1499_v42 = vmul.u32 2246822519, %v268_v39  ;;  %v236_v44 = vadd.s32 16, %v1496_v40  ;;  %v237_v45 = vadd.s32 24, %v1496_v40  ;;  %v238_v51 = vadd.s32 32, %v1496_v40 }
  0x1a   :  { %1223 = vmatmul.mubr.msk.bf16.gmra.mrb[4].mxu0 %vm95_vm0, %v51_v21  ;;  %v270_v47 = vmul.u32 2654435761, %v235_v43  ;;  %v239_v52 = vadd.s32 40, %v1496_v40  ;;  %v240_v61 = vadd.s32 48, %v1496_v40  ;;  %v241_v2 = vadd.s32 56, %v1496_v40 }
  0x1b   :  { %1226 = vmatprep.mubr.msk.bf16.mxu0 %vm95_vm0, %v52_v23  ;;  %1267 = vmatpush3.bf16.msra.mxu0 %v1484_v36  ;;  %v286_v46 = vadd.s32 %v1499_v42, %v269_v41  ;;  %v271_v49 = vmul.u32 2654435761, %v236_v44  ;;  %v272_v50 = vmul.u32 2654435761, %v237_v45  ;;  %v242_v12 = vadd.s32 64, %v1496_v40 }
  0x1c   :  { %1243 = vmatpush3.bf16.msra.mxu1 %v1309_v22  ;;  %1268 = vmatprep.subr.bf16.mxu0 %v1489_v37  ;;  %v287_v54 = vadd.s32 %v1499_v42, %v270_v47  ;;  %v273_v57 = vmul.u32 2654435761, %v238_v51  ;;  %v274_v58 = vmul.u32 2654435761, %v239_v52  ;;  %v243_v20 = vadd.s32 72, %v1496_v40 }
  0x1d   :  { %1244 = vmatprep.subr.bf16.mxu1 %v1310_v33  ;;  %v1513_v53 = vadd.s32 %v1508_v48, %v286_v46  ;;  %v288_v55 = vadd.s32 %v1499_v42, %v271_v49  ;;  %v289_v56 = vadd.s32 %v1499_v42, %v272_v50  ;;  %v275_v5 = vmul.u32 2654435761, %v240_v61 }
  0x1e   :  { %v1520_v60 = vadd.s32 %v1508_v48, %v287_v54  ;;  %v290_v0 = vadd.s32 %v1499_v42, %v273_v57  ;;  %v291_v1 = vadd.s32 %v1499_v42, %v274_v58  ;;  %v276_v10 = vmul.u32 2654435761, %v241_v2 }
  0x1f   :  { %1269 = vmatpush3.bf16.msra.mxu0 %v1489_v37  ;;  %v319_v59 = vadd.s32 19088743, %v1513_v53  ;;  %v1524_v62 = vadd.s32 %v1508_v48, %v288_v55  ;;  %v1527_v63 = vadd.s32 %v1508_v48, %v289_v56  ;;  %v292_v14 = vadd.s32 %v1499_v42, %v275_v5 }
  0x20   :  { %1245 = vmatpush3.bf16.msra.mxu1 %v1310_v33  ;;  %v320_v4 = vadd.s32 19088743, %v1520_v60  ;;  %v1536_v8 = vadd.s32 %v1508_v48, %v290_v0  ;;  %v1539_v9 = vadd.s32 %v1508_v48, %v291_v1  ;;  %v293_v19 = vadd.s32 %v1499_v42, %v276_v10 }
  0x21   :  { %1246 = vmatprep.subr.bf16.mxu1 %v1311_v34  ;;  %v335_v3 = vshrl.u32 %v319_v59, 16  ;;  %v321_v6 = vadd.s32 19088743, %v1524_v62  ;;  %v322_v7 = vadd.s32 19088743, %v1527_v63  ;;  %v244_v23 = vadd.s32 80, %v1496_v40 }
  0x22   :  { %1227 = vmatmul.mubr.msk.bf16.gmra.mrb[8].mxu0 %vm95_vm0, %v53_v28  ;;  %v336_v13 = vshrl.u32 %v320_v4, 16  ;;  %v323_v17 = vadd.s32 19088743, %v1536_v8  ;;  %v324_v18 = vadd.s32 19088743, %v1539_v9  ;;  %v245_v24 = vadd.s32 88, %v1496_v40 }
  0x23   :  { %1230 = vmatprep.mubr.msk.bf16.mxu0 %vm95_vm0, %v54_v29  ;;  %v351_v11 = vxor.u32 %v335_v3, %v319_v59  ;;  %v337_v15 = vshrl.u32 %v321_v6, 16  ;;  %v338_v16 = vshrl.u32 %v322_v7, 16  ;;  %v277_v22 = vmul.u32 2654435761, %v242_v12 }
  0x24   :  { %1247 = vmatpush3.bf16.msra.mxu1 %v1311_v34  ;;  %v352_v25 = vxor.u32 %v336_v13, %v320_v4  ;;  %v1550_v26 = vadd.s32 %v1508_v48, %v292_v14  ;;  %v339_v29 = vshrl.u32 %v323_v17, 16  ;;  %v340_v30 = vshrl.u32 %v324_v18, 16 }
  0x25   :  { %1248 = vmatprep.subr.bf16.mxu1 %v1312_v35  ;;  %v367_v21 = vmul.u32 2146121005, %v351_v11  ;;  %v353_v27 = vxor.u32 %v337_v15, %v321_v6  ;;  %v354_v28 = vxor.u32 %v338_v16, %v322_v7  ;;  %v1553_v31 = vadd.s32 %v1508_v48, %v293_v19 }
  0x26   :  { %v294_v34 = vadd.s32 %v1499_v42, %v277_v22  ;;  %v280_v38 = vmul.u32 2654435761, %v245_v24  ;;  %v368_v39 = vmul.u32 2146121005, %v352_v25  ;;  %v325_v41 = vadd.s32 19088743, %v1550_v26 }
  0x27   :  { %v383_v33 = vshrl.u32 %v367_v21, 15  ;;  %v369_v43 = vmul.u32 2146121005, %v353_v27  ;;  %v370_v44 = vmul.u32 2146121005, %v354_v28  ;;  %v355_v45 = vxor.u32 %v339_v29, %v323_v17 }
  0x28   :  { %1249 = vmatpush3.bf16.msra.mxu1 %v1312_v35  ;;  %v279_v35 = vmul.u32 2654435761, %v244_v23  ;;  %v356_v46 = vxor.u32 %v340_v30, %v324_v18  ;;  %v326_v47 = vadd.s32 19088743, %v1553_v31  ;;  %v1562_v51 = vadd.s32 %v1508_v48, %v294_v34 }
  0x29   :  { %1290 = vmatprep.subr.bf16.mxu1 %v1484_v36  ;;  %v1559_v50 = vxor.u32 %v383_v33, %v367_v21  ;;  %v297_v54 = vadd.s32 %v1499_v42, %v280_v38  ;;  %v384_v55 = vshrl.u32 %v368_v39, 15  ;;  %v341_v56 = vshrl.u32 %v325_v41, 16 }
  0x2a   :  { %1231 = vmatmul.mubr.msk.bf16.gmra.mrb[12].mxu0 %vm95_vm0, %v55_v32  ;;  %v278_v32 = vmul.u32 2654435761, %v243_v20  ;;  %v296_v52 = vadd.s32 %v1499_v42, %v279_v35  ;;  %v246_v57 = vadd.s32 96, %v1496_v40  ;;  %v247_v58 = vadd.s32 104, %v1496_v40 }
  0x2b   :  { %v385_v59 = vshrl.u32 %v369_v43, 15  ;;  %v386_v61 = vshrl.u32 %v370_v44, 15  ;;  %v248_v0 = vadd.s32 112, %v1496_v40  ;;  %v249_v1 = vadd.s32 120, %v1496_v40 }
  0x2c   :  { %v295_v49 = vadd.s32 %v1499_v42, %v278_v32  ;;  %v371_v2 = vmul.u32 2146121005, %v355_v45  ;;  %v372_v3 = vmul.u32 2146121005, %v356_v46  ;;  %v342_v4 = vshrl.u32 %v326_v47, 16 }
  0x2d   :  { %v415_v6 = vmul.u32 2221713035, %v1559_v50  ;;  %v327_v7 = vadd.s32 19088743, %v1562_v51  ;;  %v1576_v10 = vadd.s32 %v1508_v48, %v296_v52  ;;  %v1579_v11 = vadd.s32 %v1508_v48, %v297_v54 }
  0x2e   :  { %v1571_v5 = vadd.s32 %v1508_v48, %v295_v49  ;;  %v400_v12 = vxor.u32 %v384_v55, %v368_v39  ;;  %v357_v13 = vxor.u32 %v341_v56, %v325_v41  ;;  %v281_v14 = vmul.u32 2654435761, %v246_v57 }
  0x2f   :  { %v282_v40 = vmul.u32 2654435761, %v247_v58  ;;  %v401_v15 = vxor.u32 %v385_v59, %v369_v43  ;;  %v402_v16 = vxor.u32 %v386_v61, %v370_v44  ;;  %v283_v17 = vmul.u32 2654435761, %v248_v0 }
  0x30   :  { %v284_v18 = vmul.u32 2654435761, %v249_v1  ;;  %v387_v19 = vshrl.u32 %v371_v2, 15  ;;  %v388_v20 = vshrl.u32 %v372_v3, 15  ;;  %v358_v21 = vxor.u32 %v342_v4, %v326_v47 }
  0x31   :  { %v328_v22 = vadd.s32 19088743, %v1571_v5  ;;  %v343_v23 = vshrl.u32 %v327_v7, 16  ;;  %v329_v24 = vadd.s32 19088743, %v1576_v10  ;;  %v298_v29 = vadd.s32 %v1499_v42, %v281_v14 }
  0x32   :  { %v330_v25 = vadd.s32 19088743, %v1579_v11  ;;  %v416_v27 = vmul.u32 2221713035, %v400_v12  ;;  %v373_v28 = vmul.u32 2146121005, %v357_v13  ;;  %v299_v30 = vadd.s32 %v1499_v42, %v282_v40 }
  0x33   :  { %v417_v32 = vmul.u32 2221713035, %v401_v15  ;;  %v418_v33 = vmul.u32 2221713035, %v402_v16  ;;  %v300_v34 = vadd.s32 %v1499_v42, %v283_v17  ;;  %v301_v35 = vadd.s32 %v1499_v42, %v284_v18 }
  0x34   :  { %v403_v38 = vxor.u32 %v387_v19, %v371_v2  ;;  %v404_v39 = vxor.u32 %v388_v20, %v372_v3  ;;  %v374_v41 = vmul.u32 2146121005, %v358_v21  ;;  %v344_v43 = vshrl.u32 %v328_v22, 16 }
  0x35   :  { %v431_v44 = vshrl.u32 %v415_v6, 16  ;;  %v359_v45 = vxor.u32 %v343_v23, %v327_v7  ;;  %v345_v46 = vshrl.u32 %v329_v24, 16  ;;  %v346_v47 = vshrl.u32 %v330_v25, 16 }
  0x36   :  { %v432_v49 = vshrl.u32 %v416_v27, 16  ;;  %v389_v50 = vshrl.u32 %v373_v28, 15  ;;  %v1589_v52 = vadd.s32 %v1508_v48, %v298_v29  ;;  %v1592_v54 = vadd.s32 %v1508_v48, %v299_v30 }
  0x37   :  { %v433_v55 = vshrl.u32 %v417_v32, 16  ;;  %v434_v56 = vshrl.u32 %v418_v33, 16  ;;  %v1595_v42 = vadd.s32 %v1508_v48, %v300_v34  ;;  %v1598_v57 = vadd.s32 %v1508_v48, %v301_v35 }
  0x38   :  { %v419_v58 = vmul.u32 2221713035, %v403_v38  ;;  %v420_v59 = vmul.u32 2221713035, %v404_v39  ;;  %v390_v61 = vshrl.u32 %v374_v41, 15  ;;  %v360_v0 = vxor.u32 %v344_v43, %v328_v22 }
  0x39   :  { %v1600_v1 = vxor.u32 %v431_v44, %v415_v6  ;;  %v375_v2 = vmul.u32 2146121005, %v359_v45  ;;  %v361_v3 = vxor.u32 %v345_v46, %v329_v24  ;;  %v362_v4 = vxor.u32 %v346_v47, %v330_v25  ;;  %v1615_v6 = vld [vmem:[%s1809_s3] ss:$0 sm:$0xff] }
  0x3a   :  { %v1602_v7 = vxor.u32 %v432_v49, %v416_v27  ;;  %v405_v12 = vxor.u32 %v389_v50, %v373_v28  ;;  %v331_v13 = vadd.s32 19088743, %v1589_v52  ;;  %v332_v14 = vadd.s32 19088743, %v1592_v54 }
  0x3b   :  { %v1606_v40 = vxor.u32 %v433_v55, %v417_v32  ;;  %v1608_v48 = vxor.u32 %v434_v56, %v418_v33  ;;  %v333_v15 = vadd.s32 19088743, %v1595_v42  ;;  %v334_v16 = vadd.s32 19088743, %v1598_v57 }
  0x3c   :  { %v435_v17 = vshrl.u32 %v419_v58, 16  ;;  %v436_v18 = vshrl.u32 %v420_v59, 16  ;;  %v406_v19 = vxor.u32 %v390_v61, %v374_v41  ;;  %v376_v20 = vmul.u32 2146121005, %v360_v0 }
  0x3d   :  { %v391_v21 = vshrl.u32 %v375_v2, 15  ;;  %v377_v22 = vmul.u32 2146121005, %v361_v3  ;;  %v378_v23 = vmul.u32 2146121005, %v362_v4  ;;  %v347_v25 = vshrl.u32 %v331_v13, 16 }
  0x3e   :  { %vm463_vm1 = vcmp.ge.u32.totalorder %v1600_v1, 858993459  ;;  %vm464_vm2 = vcmp.ge.u32.totalorder %v1602_v7, 858993459  ;;  %v421_v24 = vmul.u32 2221713035, %v405_v12  ;;  %v1621_v32 = vxor.u32 %v435_v17, %v419_v58 }
  0x3f   :  { %v348_v27 = vshrl.u32 %v332_v14, 16  ;;  %vm465_vm3 = vcmp.ge.u32.totalorder %v1606_v40, 858993459  ;;  %vm466_vm4 = vcmp.ge.u32.totalorder %v1608_v48, 858993459  ;;  %v349_v28 = vshrl.u32 %v333_v15, 16  ;;  %vm1645_vm7 = vmpackc.low %vm464_vm2, %vm463_vm1 }
  0x40   :  { %v350_v29 = vshrl.u32 %v334_v16, 16  ;;  %v1623_v33 = vxor.u32 %v436_v18, %v420_v59  ;;  %v422_v34 = vmul.u32 2221713035, %v406_v19  ;;  %v392_v35 = vshrl.u32 %v376_v20, 15  ;;  %vm1136_vm8 = vmpackc.low %vm466_vm4, %vm465_vm3 }
  0x41   :  { %v1626_v41 = vxor.u32 %v391_v21, %v375_v2  ;;  %v393_v43 = vshrl.u32 %v377_v22, 15  ;;  %v394_v44 = vshrl.u32 %v378_v23, 15  ;;  %v437_v47 = vshrl.u32 %v421_v24, 16 }
  0x42   :  { %v363_v49 = vxor.u32 %v347_v25, %v331_v13  ;;  %v364_v50 = vxor.u32 %v348_v27, %v332_v14  ;;  %v365_v59 = vxor.u32 %v349_v28, %v333_v15  ;;  %v366_v61 = vxor.u32 %v350_v29, %v334_v16 }
  0x43   :  { %v438_v4 = vshrl.u32 %v422_v34, 16  ;;  %v408_v2 = vxor.u32 %v392_v35, %v376_v20  ;;  %v423_v17 = vmul.u32 2221713035, %v1626_v41  ;;  %v1632_v18 = vxor.u32 %v393_v43, %v377_v22 }
  0x44   :  { %v1634_v19 = vxor.u32 %v394_v44, %v378_v23  ;;  %vm467_vm5 = vcmp.ge.u32.totalorder %v1621_v32, 858993459  ;;  %vm468_vm6 = vcmp.ge.u32.totalorder %v1623_v33, 858993459  ;;  %v1638_v14 = vxor.u32 %v437_v47, %v421_v24 }
  0x45   :  { %v379_v15 = vmul.u32 2146121005, %v363_v49  ;;  %v380_v16 = vmul.u32 2146121005, %v364_v50  ;;  %v454_v22 = vxor.u32 %v438_v4, %v422_v34  ;;  %vm1668_vm11 = vmpackc.low %vm468_vm6, %vm467_vm5 }
  0x46   :  { %v381_v27 = vmul.u32 2146121005, %v365_v59  ;;  %v382_v20 = vmul.u32 2146121005, %v366_v61  ;;  %v439_v59 = vshrl.u32 %v423_v17, 16 }
  0x47   :  { %v424_v35 = vmul.u32 2221713035, %v408_v2  ;;  %v425_v41 = vmul.u32 2221713035, %v1632_v18  ;;  %v395_v1 = vshrl.u32 %v379_v15, 15 }
  0x48   :  { %v426_v43 = vmul.u32 2221713035, %v1634_v19  ;;  %v397_v50 = vshrl.u32 %v381_v27, 15  ;;  %vm469_vm9 = vcmp.ge.u32.totalorder %v1638_v14, 858993459 }
  0x49   :  { %v440_v61 = vshrl.u32 %v424_v35, 16  ;;  %v441_v48 = vshrl.u32 %v425_v41, 16  ;;  %vm470_vm10 = vcmp.ge.u32.totalorder %v454_v22, 858993459  ;;  %v411_v4 = vxor.u32 %v395_v1, %v379_v15 }
  0x4a   :  { %v413_v19 = vxor.u32 %v397_v50, %v381_v27  ;;  %vm1142_vm12 = vmpackc.low %vm470_vm10, %vm469_vm9 }
  0x4b   :  { %v457_v15 = vxor.u32 %v441_v48, %v425_v41 }
  0x4d   :  { %vm473_vm15 = vcmp.ge.u32.totalorder %v457_v15, 858993459 }
  0xe5   :  { %v1220_v30 = vpop.f32.mrb[0].mxu0 }
  0xe6   :  { %v163_v38 = vadd.f32 %v1220_v30, %v1615_v6  ;;  %v154_v39 = vpop.f32.mrb[1].mxu0 }
  0xe7   :  { %v155_v45 = vadd.f32 %v1615_v6, %v154_v39  ;;  %v1221_v46 = vpop.f32.mrb[2].mxu0 }
  0xe8   :  { %v219_v55 = vmax.f32 %v163_v38, 0.0  ;;  %v166_v56 = vadd.f32 %v1221_v46, %v1615_v6  ;;  %v157_v58 = vpop.f32.mrb[3].mxu0  ;;  %v396_v46 = vshrl.u32 %v380_v16, 15 }
  0xe9   :  { %v217_v0 = vmax.f32 %v155_v45, 0.0  ;;  %v158_v3 = vadd.f32 %v1615_v6, %v157_v58 }
  0xea   :  { %v220_v12 = vmax.f32 %v166_v56, 0.0  ;;  %v481_v21 = vmul.f32 1.25, %v219_v55  ;;  %v398_v55 = vshrl.u32 %v382_v20, 15  ;;  %v412_v2 = vxor.u32 %v396_v46, %v380_v16 }
  0xeb   :  { %v218_v13 = vmax.f32 %v158_v3, 0.0  ;;  %v479_v28 = vmul.f32 1.25, %v217_v0  ;;  %v442_v0 = vshrl.u32 %v426_v43, 16 }
  0xec   :  { %v482_v25 = vmul.f32 1.25, %v220_v12 }
  0xed   :  { %v480_v29 = vmul.f32 1.25, %v218_v13  ;;  %v1224_v30 = vpop.f32.mrb[4].mxu0  ;;  %v414_v13 = vxor.u32 %v398_v55, %v382_v20  ;;  %v458_v16 = vxor.u32 %v442_v0, %v426_v43 }
  0xee   :  { %v1137_v23 = vpack.c.bf16 %v482_v25, %v481_v21  ;;  %v179_v38 = vadd.f32 %v1224_v30, %v1615_v6  ;;  %v170_v39 = vpop.f32.mrb[5].mxu0  ;;  %v456_v30 = vxor.u32 %v440_v61, %v424_v35  ;;  %v428_v35 = vmul.u32 2221713035, %v412_v2 }
  0xef   :  { %v171_v44 = vadd.f32 %v1615_v6, %v170_v39  ;;  %v1225_v34 = vpop.f32.mrb[6].mxu0  ;;  %v1134_v45 = vpack.c.bf16 %v480_v29, %v479_v28  ;;  %v455_v29 = vxor.u32 %v439_v59, %v423_v17  ;;  %v427_v17 = vmul.u32 2221713035, %v411_v4 }
  0xf0   :  { %v223_v7 = vmax.f32 %v179_v38, 0.0  ;;  %v182_v47 = vadd.f32 %v1225_v34, %v1615_v6  ;;  %v173_v49 = vpop.f32.mrb[7].mxu0  ;;  %v429_v34 = vmul.u32 2221713035, %v413_v19  ;;  %vm472_vm14 = vcmp.ge.u32.totalorder %v456_v30, 858993459 }
  0xf1   :  { %v221_v56 = vmax.f32 %v171_v44, 0.0  ;;  %v174_v58 = vadd.f32 %v1615_v6, %v173_v49  ;;  %1250 = vmatprep.mubr.msk.bf16.mxu1 %vm1645_vm7, %v1134_v45  ;;  %v430_v45 = vmul.u32 2221713035, %v414_v13  ;;  %vm471_vm13 = vcmp.ge.u32.totalorder %v455_v29, 858993459 }
  0xf2   :  { %v224_v40 = vmax.f32 %v182_v47, 0.0  ;;  %1251 = vmatmul.mubr.msk.bf16.vlgmr.msra.gmra.mrb[0].mxu1 %vm1136_vm8, %v1137_v23  ;;  %v485_v12 = vmul.f32 1.25, %v223_v7  ;;  %vm474_vm1 = vcmp.ge.u32.totalorder %v458_v16, 858993459  ;;  %v444_v1 = vshrl.u32 %v428_v35, 16  ;;  %vm1145_vm2 = vmpackc.low %vm472_vm14, %vm471_vm13  ;;  %v1316_v16 = vld [vmem:[%s1812_s6 + $0x18] sm:$0xff]  }
  0xf3   :  { %v222_v3 = vmax.f32 %v174_v58, 0.0  ;;  %1294 = vmatpush3.bf16.msra.mxu1 %v1484_v36  ;;  %v483_v21 = vmul.f32 1.25, %v221_v56  ;;  %v445_v47 = vshrl.u32 %v429_v34, 16  ;;  %v446_v49 = vshrl.u32 %v430_v45, 16  ;;  %vm1148_vm3 = vmpackc.low %vm474_vm1, %vm473_vm15 }
  0xf4   :  { %v486_v18 = vmul.f32 1.25, %v224_v40  ;;  %1291 = vmatprep.subr.bf16.mxu1 %v1489_v37  ;;  %v460_v4 = vxor.u32 %v444_v1, %v428_v35 }
  0xf5   :  { %v484_v25 = vmul.f32 1.25, %v222_v3  ;;  %v1228_v28 = vpop.f32.mrb[8].mxu0  ;;  %v461_v19 = vxor.u32 %v445_v47, %v429_v34  ;;  %v462_v13 = vxor.u32 %v446_v49, %v430_v45  ;;  %v709_v34 = vadd.s32 144358622, %v1550_v26 }
  0xf6   :  { %v1143_v23 = vpack.c.bf16 %v486_v18, %v485_v12  ;;  %v195_v38 = vadd.f32 %v1228_v28, %v1615_v6  ;;  %v186_v39 = vpop.f32.mrb[9].mxu0  ;;  %vm476_vm5 = vcmp.ge.u32.totalorder %v460_v4, 858993459 }
  0xf7   :  { %v1140_v27 = vpack.c.bf16 %v484_v25, %v483_v21  ;;  %v187_v20 = vadd.f32 %v1615_v6, %v186_v39  ;;  %v1229_v24 = vpop.f32.mrb[10].mxu0  ;;  %1295 = vmatpush3.bf16.msra.mxu1 %v1489_v37  ;;  %v443_v37 = vshrl.u32 %v427_v17, 16  ;;  %vm477_vm6 = vcmp.ge.u32.totalorder %v461_v19, 858993459 }
  0xf8   :  { %v227_v32 = vmax.f32 %v195_v38, 0.0  ;;  %v198_v33 = vadd.f32 %v1229_v24, %v1615_v6  ;;  %v189_v44 = vpop.f32.mrb[11].mxu0  ;;  %vm478_vm7 = vcmp.ge.u32.totalorder %v462_v13, 858993459  ;;  %v706_v24 = vadd.s32 144358622, %v1527_v63 }
  0xf9   :  { %v225_v41 = vmax.f32 %v187_v20, 0.0  ;;  %v190_v43 = vadd.f32 %v1615_v6, %v189_v44  ;;  %1254 = vmatprep.mubr.msk.bf16.mxu1 %vm1668_vm11, %v1140_v27  ;;  %v459_v3 = vxor.u32 %v443_v37, %v427_v17  ;;  %vm1154_vm9 = vmpackc.low %vm478_vm7, %vm477_vm6  ;;  %v705_v27 = vadd.s32 144358622, %v1524_v62 }
  0xfa   :  { %v228_v14 = vmax.f32 %v198_v33, 0.0  ;;  %1255 = vmatmul.mubr.msk.bf16.gmra.mrb[4].mxu1 %vm1142_vm12, %v1143_v23  ;;  %v489_v46 = vmul.f32 1.25, %v227_v32  ;;  %v703_v20 = vadd.s32 144358622, %v1513_v53  ;;  %v704_v17 = vadd.s32 144358622, %v1520_v60 }
  0xfb   :  { %v226_v22 = vmax.f32 %v190_v43, 0.0  ;;  %v487_v50 = vmul.f32 1.25, %v225_v41  ;;  %vm475_vm4 = vcmp.ge.u32.totalorder %v459_v3, 858993459  ;;  %v721_v35 = vshrl.u32 %v705_v27, 16 }
  0xfc   :  { %v490_v7 = vmul.f32 1.25, %v228_v14  ;;  %vm1151_vm8 = vmpackc.low %vm476_vm5, %vm475_vm4  ;;  %v719_v32 = vshrl.u32 %v703_v20, 16  ;;  %v722_v33 = vshrl.u32 %v706_v24, 16  ;;  %v720_v44 = vshrl.u32 %v704_v17, 16 }
  0xfd   :  { %v488_v55 = vmul.f32 1.25, %v226_v22  ;;  %v1232_v56 = vpop.f32.mrb[12].mxu0  ;;  %v737_v45 = vxor.u32 %v721_v35, %v705_v27  ;;  %v707_v41 = vadd.s32 144358622, %v1536_v8  ;;  %v725_v37 = vshrl.u32 %v709_v34, 16 }
  0xfe   :  { %v1149_v58 = vpack.c.bf16 %v490_v7, %v489_v46  ;;  %v211_v59 = vadd.f32 %v1232_v56, %v1615_v6  ;;  %v202_v61 = vpop.f32.mrb[13].mxu0  ;;  %v735_v43 = vxor.u32 %v719_v32, %v703_v20  ;;  %v738_v14 = vxor.u32 %v722_v33, %v706_v24 }
  0xff   :  { %v1146_v40 = vpack.c.bf16 %v488_v55, %v487_v50  ;;  %v203_v48 = vadd.f32 %v1615_v6, %v202_v61  ;;  %v1233_v0 = vpop.f32.mrb[14].mxu0  ;;  %v736_v22 = vxor.u32 %v720_v44, %v704_v17  ;;  %v710_v62 = vadd.s32 144358622, %v1553_v31 }
 0x100   :  { %v231_v2 = vmax.f32 %v211_v59, 0.0  ;;  %v214_v12 = vadd.f32 %v1233_v0, %v1615_v6  ;;  %v205_v18 = vpop.f32.mrb[15].mxu0  ;;  %v753_v53 = vmul.u32 2146121005, %v737_v45  ;;  %v723_v1 = vshrl.u32 %v707_v41, 16 }
 0x101   :  { %v229_v21 = vmax.f32 %v203_v48, 0.0  ;;  %v206_v25 = vadd.f32 %v1615_v6, %v205_v18  ;;  %1258 = vmatprep.mubr.msk.bf16.mxu1 %vm1145_vm2, %v1146_v40  ;;  %v1315_v6 = vld [vmem:[%s1812_s6 + $0x10] sm:$0xff]   ;;  %v751_v63 = vmul.u32 2146121005, %v735_v43  ;;  %v708_v60 = vadd.s32 144358622, %v1539_v9 }
 0x102   :  { %v232_v28 = vmax.f32 %v214_v12, 0.0  ;;  %1259 = vmatmul.mubr.msk.bf16.gmra.mrb[8].mxu1 %vm1148_vm3, %v1149_v58  ;;  %v493_v30 = vmul.f32 1.25, %v231_v2  ;;  %1270 = vmatprep.subr.bf16.mxu0 %v1315_v6  ;;  %v754_v46 = vmul.u32 2146121005, %v738_v14  ;;  %v752_v7 = vmul.u32 2146121005, %v736_v22 }
 0x103   :  { %v230_v29 = vmax.f32 %v206_v25, 0.0  ;;  %v491_v38 = vmul.f32 1.25, %v229_v21  ;;  %1292 = vmatprep.subr.bf16.mxu1 %v1315_v6  ;;  %1271 = vmatpush3.bf16.msra.mxu0 %v1315_v6  ;;  %v741_v47 = vxor.u32 %v725_v37, %v709_v34  ;;  %v726_v49 = vshrl.u32 %v710_v62, 16 }
 0x104   :  { %v494_v23 = vmul.f32 1.25, %v232_v28  ;;  %1296 = vmatpush3.bf16.msra.mxu1 %v1315_v6  ;;  %1272 = vmatprep.subr.bf16.mxu0 %v1316_v16  ;;  %v769_v50 = vshrl.u32 %v753_v53, 15  ;;  %v739_v26 = vxor.u32 %v723_v1, %v707_v41  ;;  %v713_v55 = vadd.s32 144358622, %v1576_v10 }
 0x105   :  { %v492_v39 = vmul.f32 1.25, %v230_v29  ;;  %1293 = vmatprep.subr.bf16.mxu1 %v1316_v16  ;;  %v767_v8 = vshrl.u32 %v751_v63, 15  ;;  %v724_v56 = vshrl.u32 %v708_v60, 16  ;;  %v711_v58 = vadd.s32 144358622, %v1562_v51 }
 0x106   :  { %v1155_v36 = vpack.c.bf16 %v494_v23, %v493_v30  ;;  %v714_v59 = vadd.s32 144358622, %v1579_v11  ;;  %v770_v31 = vshrl.u32 %v754_v46, 15  ;;  %v768_v61 = vshrl.u32 %v752_v7, 15 }
 0x107   :  { %v1152_v15 = vpack.c.bf16 %v492_v39, %v491_v38  ;;  %1273 = vmatpush3.bf16.msra.mxu0 %v1316_v16  ;;  %v757_v40 = vmul.u32 2146121005, %v741_v47  ;;  %v742_v48 = vxor.u32 %v726_v49, %v710_v62  ;;  %v712_v9 = vadd.s32 144358622, %v1571_v5 }
 0x108   :  { %1297 = vmatpush3.bf16.msra.mxu1 %v1316_v16  ;;  %v785_v0 = vxor.u32 %v769_v50, %v753_v53  ;;  %v755_v3 = vmul.u32 2146121005, %v739_v26  ;;  %v729_v4 = vshrl.u32 %v713_v55, 16  ;;  %v783_v2 = vxor.u32 %v767_v8, %v751_v63 }
 0x109   :  { %1262 = vmatprep.mubr.msk.bf16.mxu1 %vm1151_vm8, %v1152_v15  ;;  %v740_v12 = vxor.u32 %v724_v56, %v708_v60  ;;  %v727_v18 = vshrl.u32 %v711_v58, 16  ;;  %v730_v19 = vshrl.u32 %v714_v59, 16  ;;  %v786_v10 = vxor.u32 %v770_v31, %v754_v46 }
 0x10a   :  { %1263 = vmatmul.mubr.msk.bf16.gmra.mrb[12].mxu1 %vm1154_vm9, %v1155_v36  ;;  %v784_v13 = vxor.u32 %v768_v61, %v752_v7  ;;  %v773_v21 = vshrl.u32 %v757_v40, 15  ;;  %v758_v25 = vmul.u32 2146121005, %v742_v48  ;;  %v728_v51 = vshrl.u32 %v712_v9, 16 }
 0x10b   :  { %v801_v28 = vmul.u32 2221713035, %v785_v0  ;;  %v771_v11 = vshrl.u32 %v755_v3, 15  ;;  %v745_v29 = vxor.u32 %v729_v4, %v713_v55  ;;  %v799_v30 = vmul.u32 2221713035, %v783_v2 }
 0x10c   :  { %v756_v23 = vmul.u32 2146121005, %v740_v12  ;;  %v743_v38 = vxor.u32 %v727_v18, %v711_v58  ;;  %v746_v39 = vxor.u32 %v730_v19, %v714_v59  ;;  %v802_v5 = vmul.u32 2221713035, %v786_v10  ;;  %v1724_v59 = vld [vmem:[%s1811_s5] ss:$0 sm:$0xff] }
 0x10d   :  { %v800_v36 = vmul.u32 2221713035, %v784_v13  ;;  %v789_v15 = vxor.u32 %v773_v21, %v757_v40  ;;  %v774_v6 = vshrl.u32 %v758_v25, 15  ;;  %v744_v16 = vxor.u32 %v728_v51, %v712_v9 }
 0x10e   :  { %v817_v27 = vshrl.u32 %v801_v28, 16  ;;  %v787_v20 = vxor.u32 %v771_v11, %v755_v3  ;;  %v761_v24 = vmul.u32 2146121005, %v745_v29  ;;  %v815_v17 = vshrl.u32 %v799_v30, 16 }
 0x10f   :  { %v772_v35 = vshrl.u32 %v756_v23, 15  ;;  %v759_v32 = vmul.u32 2146121005, %v743_v38  ;;  %v762_v33 = vmul.u32 2146121005, %v746_v39  ;;  %v818_v44 = vshrl.u32 %v802_v5, 16 }
 0x110   :  { %v816_v34 = vshrl.u32 %v800_v36, 16  ;;  %v717_v45 = vadd.s32 144358622, %v1595_v42  ;;  %v805_v41 = vmul.u32 2221713035, %v789_v15  ;;  %v790_v43 = vxor.u32 %v774_v6, %v758_v25 }
 0x111   :  { %v760_v14 = vmul.u32 2146121005, %v744_v16  ;;  %v715_v22 = vadd.s32 144358622, %v1589_v52  ;;  %v1709_v37 = vxor.u32 %v817_v27, %v801_v28  ;;  %v803_v62 = vmul.u32 2221713035, %v787_v20 }
 0x112   :  { %v777_v53 = vshrl.u32 %v761_v24, 15  ;;  %v718_v1 = vadd.s32 144358622, %v1598_v57  ;;  %v1712_v63 = vxor.u32 %v815_v17, %v799_v30  ;;  %v788_v60 = vxor.u32 %v772_v35, %v756_v23 }
 0x113   :  { %v775_v46 = vshrl.u32 %v759_v32, 15  ;;  %v778_v7 = vshrl.u32 %v762_v33, 15  ;;  %v1714_v47 = vxor.u32 %v818_v44, %v802_v5  ;;  %v1716_v49 = vxor.u32 %v816_v34, %v800_v36 }
 0x114   :  { %v733_v42 = vshrl.u32 %v717_v45, 16  ;;  %v716_v50 = vadd.s32 144358622, %v1592_v54  ;;  %v821_v26 = vshrl.u32 %v805_v41, 16  ;;  %v806_v52 = vmul.u32 2221713035, %v790_v43 }
 0x115   :  { %v776_v55 = vshrl.u32 %v760_v14, 15  ;;  %v731_v8 = vshrl.u32 %v715_v22, 16  ;;  %v819_v56 = vshrl.u32 %v803_v62, 16  ;;  %v1719_v58 = vxor.u32 %v777_v53, %v761_v24 }
 0x116   :  { %v734_v57 = vshrl.u32 %v718_v1, 16  ;;  %vm849_vm10 = vcmp.ge.u32.totalorder %v1709_v37, 2147483648  ;;  %v804_v31 = vmul.u32 2221713035, %v788_v60  ;;  %v1727_v61 = vxor.u32 %v775_v46, %v759_v32 }
 0x117   :  { %v1729_v40 = vxor.u32 %v778_v7, %v762_v33  ;;  %vm847_vm11 = vcmp.ge.u32.totalorder %v1712_v63, 2147483648  ;;  %vm850_vm12 = vcmp.ge.u32.totalorder %v1714_v47, 2147483648  ;;  %vm848_vm13 = vcmp.ge.u32.totalorder %v1716_v49, 2147483648 }
 0x118   :  { %v1734_v54 = vxor.u32 %v733_v42, %v717_v45  ;;  %v732_v48 = vshrl.u32 %v716_v50, 16  ;;  %v1736_v0 = vxor.u32 %v821_v26, %v805_v41  ;;  %v822_v3 = vshrl.u32 %v806_v52, 16 }
 0x119   :  { %v1738_v4 = vxor.u32 %v776_v55, %v760_v14  ;;  %v747_v2 = vxor.u32 %v731_v8, %v715_v22  ;;  %v1741_v19 = vxor.u32 %v819_v56, %v803_v62  ;;  %v809_v10 = vmul.u32 2221713035, %v1719_v58 }
 0x11a   :  { %v750_v13 = vxor.u32 %v734_v57, %v718_v1  ;;  %v820_v51 = vshrl.u32 %v804_v31, 16  ;;  %v807_v28 = vmul.u32 2221713035, %v1727_v61  ;;  %v810_v11 = vmul.u32 2221713035, %v1729_v40 }
 0x11b   :  { %v765_v38 = vmul.u32 2146121005, %v1734_v54  ;;  %v748_v39 = vxor.u32 %v732_v48, %v716_v50  ;;  %v808_v15 = vmul.u32 2221713035, %v1738_v4  ;;  %v838_v20 = vxor.u32 %v822_v3, %v806_v52 }
 0x11c   :  { %v763_v6 = vmul.u32 2146121005, %v747_v2  ;;  %v766_v24 = vmul.u32 2146121005, %v750_v13  ;;  %vm853_vm14 = vcmp.ge.u32.totalorder %v1736_v0, 2147483648  ;;  %v836_v32 = vxor.u32 %v820_v51, %v804_v31 }
 0x11d   :  { %v825_v33 = vshrl.u32 %v809_v10, 16  ;;  %vm851_vm15 = vcmp.ge.u32.totalorder %v1741_v19, 2147483648  ;;  %v823_v34 = vshrl.u32 %v807_v28, 16  ;;  %v826_v45 = vshrl.u32 %v810_v11, 16 }
 0x11e   :  { %v764_v41 = vmul.u32 2146121005, %v748_v39  ;;  %v824_v22 = vshrl.u32 %v808_v15, 16  ;;  %v781_v62 = vshrl.u32 %v765_v38, 15  ;;  %v779_v53 = vshrl.u32 %v763_v6, 15 }
 0x11f   :  { %v782_v42 = vshrl.u32 %v766_v24, 15  ;;  %vm854_vm1 = vcmp.ge.u32.totalorder %v838_v20, 2147483648  ;;  %vm852_vm2 = vcmp.ge.u32.totalorder %v836_v32, 2147483648  ;;  %v841_v2 = vxor.u32 %v825_v33, %v809_v10 }
 0x120   :  { %v780_v31 = vshrl.u32 %v764_v41, 15  ;;  %v797_v54 = vxor.u32 %v781_v62, %v765_v38  ;;  %v795_v48 = vxor.u32 %v779_v53, %v763_v6  ;;  %v842_v13 = vxor.u32 %v826_v45, %v810_v11 }
 0x121   :  { %v798_v49 = vxor.u32 %v782_v42, %v766_v24  ;;  %vm857_vm3 = vcmp.ge.u32.totalorder %v841_v2, 2147483648 }
 0x122   :  { %vm858_vm4 = vcmp.ge.u32.totalorder %v842_v13, 2147483648 }
 0x123   :  { %v814_v6 = vmul.u32 2221713035, %v798_v49 }
 0x125   :  { %v830_v32 = vshrl.u32 %v814_v6, 16 }
 0x1c5   :  { %v1252_v9 = vpop.f32.mrb[0].mxu1 }
 0x1c6   :  { %v633_v12 = vadd.f32 %v1252_v9, %v1724_v59  ;;  %v624_v18 = vpop.f32.mrb[1].mxu1 }
 0x1c7   :  { %v625_v21 = vadd.f32 %v1724_v59, %v624_v18  ;;  %v1253_v25 = vpop.f32.mrb[2].mxu1  ;;  %v839_v18 = vxor.u32 %v823_v34, %v807_v28 }
 0x1c8   :  { %v689_v29 = vmax.f32 %v633_v12, 0.0  ;;  %v636_v30 = vadd.f32 %v1253_v25, %v1724_v59  ;;  %v627_v23 = vpop.f32.mrb[3].mxu1 }
 0x1c9   :  { %v687_v5 = vmax.f32 %v625_v21, 0.0  ;;  %v628_v36 = vadd.f32 %v1724_v59, %v627_v23  ;;  %v796_v21 = vxor.u32 %v780_v31, %v764_v41  ;;  %v811_v23 = vmul.u32 2221713035, %v795_v48 }
 0x1ca   :  { %v865_v16 = vmul.f32 2.0, %v689_v29  ;;  %v690_v27 = vmax.f32 %v636_v30, 0.0  ;;  %v840_v29 = vxor.u32 %v824_v22, %v808_v15  ;;  %v813_v30 = vmul.u32 2221713035, %v797_v54 }
 0x1cb   :  { %v863_v17 = vmul.f32 2.0, %v687_v5  ;;  %v688_v35 = vmax.f32 %v628_v36, 0.0  ;;  %v812_v20 = vmul.u32 2221713035, %v796_v21  ;;  %vm855_vm5 = vcmp.ge.u32.totalorder %v839_v18, 2147483648 }
 0x1cc   :  { %v866_v44 = vmul.f32 2.0, %v690_v27  ;;  %v881_v1 = vsel %vm849_vm10, %v865_v16, 0.0  ;;  %v829_v33 = vshrl.u32 %v813_v30, 16  ;;  %vm856_vm6 = vcmp.ge.u32.totalorder %v840_v29, 2147483648 }
 0x1cd   :  { %v864_v43 = vmul.f32 2.0, %v688_v35  ;;  %v1256_v14 = vpop.f32.mrb[4].mxu1  ;;  %v879_v50 = vsel %vm847_vm11, %v863_v17, 0.0 }
 0x1ce   :  { %v882_v60 = vsel %vm850_vm12, %v866_v44, 0.0  ;;  %v649_v46 = vadd.f32 %v1256_v14, %v1724_v59  ;;  %v640_v7 = vpop.f32.mrb[5].mxu1  ;;  %v827_v44 = vshrl.u32 %v811_v23, 16  ;;  %v828_v14 = vshrl.u32 %v812_v20, 16 }
 0x1cf   :  { %v896_v26 = vpack.c.bf16 %v882_v60, %v881_v1  ;;  %v880_v52 = vsel %vm848_vm13, %v864_v43, 0.0  ;;  %v641_v55 = vadd.f32 %v1724_v59, %v640_v7  ;;  %v1257_v8 = vpop.f32.mrb[6].mxu1  ;;  %v845_v53 = vxor.u32 %v829_v33, %v813_v30 }
 0x1d0   :  { %v895_v56 = vpack.c.bf16 %v880_v52, %v879_v50  ;;  %v693_v37 = vmax.f32 %v649_v46, 0.0  ;;  %v652_v57 = vadd.f32 %v1257_v8, %v1724_v59  ;;  %v643_v47 = vpop.f32.mrb[7].mxu1  ;;  %v843_v1 = vxor.u32 %v827_v44, %v811_v23 }
 0x1d1   :  { %v691_v61 = vmax.f32 %v641_v55, 0.0  ;;  %v644_v40 = vadd.f32 %v1724_v59, %v643_v47  ;;  %v846_v50 = vxor.u32 %v830_v32, %v814_v6  ;;  %vm861_vm7 = vcmp.ge.u32.totalorder %v845_v53, 2147483648 }
 0x1d2   :  { %v869_v63 = vmul.f32 2.0, %v693_v37  ;;  %v694_v9 = vmax.f32 %v652_v57, 0.0  ;;  %1274 = vmatprep.mubr.msk.bf16.mxu0 %vm95_vm0, %v895_v56  ;;  %vm859_vm9 = vcmp.ge.u32.totalorder %v843_v1, 2147483648 }
 0x1d3   :  { %v867_v3 = vmul.f32 2.0, %v691_v61  ;;  %v692_v4 = vmax.f32 %v644_v40, 0.0  ;;  %1275 = vmatmul.mubr.msk.bf16.vlgmr.msra.gmra.mrb[16].mxu0 %vm95_vm0, %v896_v26  ;;  %v844_v61 = vxor.u32 %v828_v14, %v812_v20  ;;  %vm862_vm8 = vcmp.ge.u32.totalorder %v846_v50, 2147483648 }
 0x1d4   :  { %v870_v12 = vmul.f32 2.0, %v694_v9  ;;  %v885_v38 = vsel %vm853_vm14, %v869_v63, 0.0 }
 0x1d5   :  { %v868_v25 = vmul.f32 2.0, %v692_v4  ;;  %v1260_v51 = vpop.f32.mrb[8].mxu1  ;;  %v883_v58 = vsel %vm851_vm15, %v867_v3, 0.0  ;;  %vm860_vm10 = vcmp.ge.u32.totalorder %v844_v61, 2147483648 }
 0x1d6   :  { %v886_v39 = vsel %vm854_vm1, %v870_v12, 0.0  ;;  %v665_v5 = vadd.f32 %v1260_v51, %v1724_v59  ;;  %v656_v36 = vpop.f32.mrb[9].mxu1 }
 0x1d7   :  { %v898_v10 = vpack.c.bf16 %v886_v39, %v885_v38  ;;  %v884_v28 = vsel %vm852_vm2, %v868_v25, 0.0  ;;  %v657_v11 = vadd.f32 %v1724_v59, %v656_v36  ;;  %v1261_v15 = vpop.f32.mrb[10].mxu1  ;;  %v1157_v25 = vld [vmem:[%s1813_s7] ss:$0 sm:$0xff]  ;;  %s1341_s7 = smov [#allocation4]  }
 0x1d8   :  { %v897_v16 = vpack.c.bf16 %v884_v28, %v883_v58  ;;  %v697_v27 = vmax.f32 %v665_v5, 0.0  ;;  %v668_v0 = vadd.f32 %v1261_v15, %v1724_v59  ;;  %v659_v24 = vpop.f32.mrb[11].mxu1  ;;  %s1100_s25 = sshll.u32 %s1341_s7, 4  ;;  %s1101_s25 = int_to_ptr.vmem [resolvable:$true] %s1100_s25 }
 0x1d9   :  { %v695_v17 = vmax.f32 %v657_v11, 0.0  ;;  %v660_v35 = vadd.f32 %v1724_v59, %v659_v24  ;;  %s1317_s26 = scalar_lea.vmem %s1101_s25, 2048  ;;  %p1322_p1 = scmp.lt.s32.totalorder %s1101_s25, %s1101_s25 }
 0x1da   :  { %v873_v34 = vmul.f32 2.0, %v697_v27  ;;  %v698_v19 = vmax.f32 %v668_v0, 0.0  ;;  %1278 = vmatprep.mubr.msk.bf16.mxu0 %vm95_vm0, %v897_v16  ;;  %p1318_p0 = scmp.ne.s32.totalorder %s1101_s25, %s1317_s26  ;;  %p1323_p2 = scmp.lt.s32.totalorder %s1317_s26, %s1317_s26 }
 0x1db   :  { %v871_v45 = vmul.f32 2.0, %v695_v17  ;;  %v696_v41 = vmax.f32 %v660_v35, 0.0  ;;  %1279 = vmatmul.mubr.msk.bf16.gmra.mrb[20].mxu0 %vm95_vm0, %v898_v10 }
 0x1dc   :  { %v874_v43 = vmul.f32 2.0, %v698_v19  ;;  %v889_v60 = vsel %vm857_vm3, %v873_v34, 0.0  ;;  %p1324_p3 = por %p1323_p2, %p1322_p1 }
 0x1dd   :  { %v872_v22 = vmul.f32 2.0, %v696_v41  ;;  %v1264_v62 = vpop.f32.mrb[12].mxu1  ;;  %v887_v26 = vsel %vm855_vm5, %v871_v45, 0.0 }
 0x1de   :  { %v890_v46 = vsel %vm858_vm4, %v874_v43, 0.0  ;;  %v681_v7 = vadd.f32 %v1264_v62, %v1724_v59  ;;  %v672_v42 = vpop.f32.mrb[13].mxu1  ;;  %p1325_p4 = pnand %p1324_p3, %p1318_p0 }
 0x1df   :  { %v900_v52 = vpack.c.bf16 %v890_v46, %v889_v60  ;;  %v888_v55 = vsel %vm856_vm6, %v872_v22, 0.0  ;;  %v673_v8 = vadd.f32 %v1724_v59, %v672_v42  ;;  %v1265_v56 = vpop.f32.mrb[14].mxu1 }
 0x1e0   :  { %v899_v37 = vpack.c.bf16 %v888_v55, %v887_v26  ;;  %v701_v57 = vmax.f32 %v681_v7, 0.0  ;;  %v684_v47 = vadd.f32 %v1265_v56, %v1724_v59  ;;  %v675_v31 = vpop.f32.mrb[15].mxu1 }
 0x1e1   :  { %v699_v40 = vmax.f32 %v673_v8, 0.0  ;;  %v676_v54 = vadd.f32 %v1724_v59, %v675_v31 }
 0x1e2   :  { %v877_v48 = vmul.f32 2.0, %v701_v57  ;;  %v702_v63 = vmax.f32 %v684_v47, 0.0  ;;  %1282 = vmatprep.mubr.msk.bf16.mxu0 %vm95_vm0, %v899_v37 }
 0x1e3   :  { %v875_v9 = vmul.f32 2.0, %v699_v40  ;;  %v700_v49 = vmax.f32 %v676_v54, 0.0  ;;  %1283 = vmatmul.mubr.msk.bf16.gmra.mrb[24].mxu0 %vm95_vm0, %v900_v52 }
 0x1e4   :  { %v878_v3 = vmul.f32 2.0, %v702_v63  ;;  %v893_v2 = vsel %vm861_vm7, %v877_v48, 0.0 }
 0x1e5   :  { %v876_v4 = vmul.f32 2.0, %v700_v49  ;;  %v891_v18 = vsel %vm859_vm9, %v875_v9, 0.0 }
 0x1e6   :  { %v894_v12 = vsel %vm862_vm8, %v878_v3, 0.0 }
 0x1e7   :  { %v902_v13 = vpack.c.bf16 %v894_v12, %v893_v2  ;;  %v892_v21 = vsel %vm860_vm10, %v876_v4, 0.0 }
 0x1e8   :  { %v901_v59 = vpack.c.bf16 %v892_v21, %v891_v18 }
 0x1ea   :  { %1286 = vmatprep.mubr.msk.bf16.mxu1 %vm95_vm0, %v901_v59 }
 0x1eb   :  { %1287 = vmatmul.mubr.msk.bf16.vlgmr.msra.gmra.mrb[16].mxu1 %vm95_vm0, %v902_v13 }
 0x2a6   :  { %v1276_v51 = vpop.f32.mrb[16].mxu0 }
 0x2a7   :  { %v1009_v29 = vadd.f32 %v1276_v51, %v1157_v25  ;;  %v1000_v30 = vpop.f32.mrb[17].mxu0 }
 0x2a8   :  { %v1001_v23 = vadd.f32 %v1157_v25, %v1000_v30  ;;  %v1277_v38 = vpop.f32.mrb[18].mxu0 }
 0x2a9   :  { %v1065_v39 = vmax.f32 %v1009_v29, 0.0  ;;  %v1012_v5 = vadd.f32 %v1277_v38, %v1157_v25  ;;  %v1003_v36 = vpop.f32.mrb[19].mxu0 }
 0x2aa   :  { %v1063_v6 = vmax.f32 %v1001_v23, 0.0  ;;  %v1004_v58 = vadd.f32 %v1157_v25, %v1003_v36 }
 0x2ab   :  { %1081 = vst [vmem:[#allocation4 + $0x10] sm:$0xff] %v1065_v39  ;;  %v1066_v10 = vmax.f32 %v1012_v5, 0.0 }
 0x2ac   :  { %1079 = vst [vmem:[#allocation4] sm:$0xff] %v1063_v6  ;;  %v1064_v28 = vmax.f32 %v1004_v58, 0.0 }
 0x2ad   :  { %1082 = vst [vmem:[#allocation4 + $0x18] sm:$0xff] %v1066_v10 }
 0x2ae   :  { %1080 = vst [vmem:[#allocation4 + $0x8] sm:$0xff] %v1064_v28  ;;  %v1280_v11 = vpop.f32.mrb[20].mxu0 }
 0x2af   :  { %v1025_v15 = vadd.f32 %v1280_v11, %v1157_v25  ;;  %v1016_v16 = vpop.f32.mrb[21].mxu0 }
 0x2b0   :  { %v1017_v27 = vadd.f32 %v1157_v25, %v1016_v16  ;;  %v1281_v0 = vpop.f32.mrb[22].mxu0 }
 0x2b1   :  { %v1069_v24 = vmax.f32 %v1025_v15, 0.0  ;;  %v1028_v20 = vadd.f32 %v1281_v0, %v1157_v25  ;;  %v1019_v17 = vpop.f32.mrb[23].mxu0 }
 0x2b2   :  { %v1067_v35 = vmax.f32 %v1017_v27, 0.0  ;;  %v1020_v33 = vadd.f32 %v1157_v25, %v1019_v17 }
 0x2b3   :  { %1085 = vst [vmem:[#allocation4 + $0x30] sm:$0xff] %v1069_v24  ;;  %v1070_v44 = vmax.f32 %v1028_v20, 0.0 }
 0x2b4   :  { %1083 = vst [vmem:[#allocation4 + $0x20] sm:$0xff] %v1067_v35  ;;  %v1068_v34 = vmax.f32 %v1020_v33, 0.0 }
 0x2b5   :  { %1086 = vst [vmem:[#allocation4 + $0x38] sm:$0xff] %v1070_v44 }
 0x2b6   :  { %1084 = vst [vmem:[#allocation4 + $0x28] sm:$0xff] %v1068_v34  ;;  %v1284_v19 = vpop.f32.mrb[24].mxu0 }
 0x2b7   :  { %v1041_v32 = vadd.f32 %v1284_v19, %v1157_v25  ;;  %v1032_v45 = vpop.f32.mrb[25].mxu0 }
 0x2b8   :  { %v1033_v41 = vadd.f32 %v1157_v25, %v1032_v45  ;;  %v1285_v43 = vpop.f32.mrb[26].mxu0 }
 0x2b9   :  { %v1073_v14 = vmax.f32 %v1041_v32, 0.0  ;;  %v1044_v22 = vadd.f32 %v1285_v43, %v1157_v25  ;;  %v1035_v62 = vpop.f32.mrb[27].mxu0 }
 0x2ba   :  { %v1071_v53 = vmax.f32 %v1033_v41, 0.0  ;;  %v1036_v1 = vadd.f32 %v1157_v25, %v1035_v62 }
 0x2bb   :  { %1089 = vst [vmem:[#allocation4 + $0x50] sm:$0xff] %v1073_v14  ;;  %v1074_v60 = vmax.f32 %v1044_v22, 0.0 }
 0x2bc   :  { %1087 = vst [vmem:[#allocation4 + $0x40] sm:$0xff] %v1071_v53  ;;  %v1072_v46 = vmax.f32 %v1036_v1, 0.0 }
 0x2bd   :  { %1090 = vst [vmem:[#allocation4 + $0x58] sm:$0xff] %v1074_v60 }
 0x2be   :  { %1088 = vst [vmem:[#allocation4 + $0x48] sm:$0xff] %v1072_v46  ;;  %v1288_v7 = vpop.f32.mrb[16].mxu1 }
 0x2bf   :  { %v1057_v42 = vadd.f32 %v1288_v7, %v1157_v25  ;;  %v1048_v50 = vpop.f32.mrb[17].mxu1 }
 0x2c0   :  { %v1049_v26 = vadd.f32 %v1157_v25, %v1048_v50  ;;  %v1289_v52 = vpop.f32.mrb[18].mxu1 }
 0x2c1   :  { %v1077_v55 = vmax.f32 %v1057_v42, 0.0  ;;  %v1060_v8 = vadd.f32 %v1289_v52, %v1157_v25  ;;  %v1051_v56 = vpop.f32.mrb[19].mxu1 }
 0x2c2   :  { %v1075_v37 = vmax.f32 %v1049_v26, 0.0  ;;  %v1052_v57 = vadd.f32 %v1157_v25, %v1051_v56 }
 0x2c3   :  { %1093 = vst [vmem:[#allocation4 + $0x70] sm:$0xff] %v1077_v55  ;;  %v1078_v47 = vmax.f32 %v1060_v8, 0.0 }
 0x2c4   :  { %1091 = vst [vmem:[#allocation4 + $0x60] sm:$0xff] %v1075_v37  ;;  %v1076_v31 = vmax.f32 %v1052_v57, 0.0 }
 0x2c5   :  { %1094 = vst [vmem:[#allocation4 + $0x78] sm:$0xff] %v1078_v47 }
 0x2c6   :  { %1092 = vst [vmem:[#allocation4 + $0x68] sm:$0xff] %v1076_v31 }
 0x2c7   :  { %1328 = shalt.err (!%p1325_p4)
}
 0x2c8   :  { %s1329_s28 = scalar_lea.hbm %s1814_s8, 2048 }
 0x2c9   :  { %p1330_p5 = scmp.ne.s32.totalorder %s1814_s8, %s1329_s28  ;;  %p1333_p6 = scmp.lt.u32.totalorder %s1329_s28, %s1814_s8 }
 0x2cb   :  { %p1335_p7 = pnand %p1333_p6, %p1330_p5 }
 0x2cd   :  { %1338 = shalt.err (!%p1335_p7)
}
 0x2ce   :  { %s1342_s11 = smov 128   ;;  %s1343_s12 = smov 8  }
 0x2cf   :  { %1106 = dma.vmem_to_hbm [thread:$0]  %s1101_s25, 2048, %s1814_s8, [#allocation5], %s1342_s11, %s1342_s11, %s1343_s12  }
 0x2d0   :  { %1339 = dma.done.wait [#allocation5], 2048  }
 0x2d1   :  { %1340 = vsyncadd [#allocation5], 4294965248 }
 0x2d2   :  { %1110 = vsyncpa [#allocation5], 1 }

</bundles_post_ra>
